<compile_context>
chip_gen: v5e
topology: v5e:2x2
jax: 0.10.0
libtpu: 0.0.40
codegen_flags: <defaults>
</compile_context>

<pallas_src>
import math
import jax
import jax.numpy as jnp
import numpy as np
from jax.experimental import pallas as pl
from jax.experimental.pallas import tpu as pltpu


def attn_kernel(qk_ref, v_ref, mask_ref, wf_ref, bf_ref, o_ref):
    # qk_ref: (1, 2S, D) = [q ; k] for this batch, v_ref: (1, S, Dv_pad),
    # mask_ref: (1, S, S), wf_ref: (D, D) laid out (in, out), bf_ref: (1, D)
    two_s = qk_ref.shape[1]
    S = two_s // 2

    x = qk_ref[0]                                                  # (2S, D)
    # fused affine projection (no transpose: wf is already (in, out))
    h = jnp.dot(x, wf_ref[...], preferred_element_type=jnp.float32) + bf_ref[...]

    scale = 1.0 / math.sqrt(h.shape[-1])
    q2 = h[:S] * scale                                             # fold 1/sqrt(D) into q2 (S*D elems)
    k2 = h[S:]                                                     # (S, D)

    # q2 @ k2.T without materializing a transpose
    qk = jax.lax.dot_general(q2, k2, (((1,), (1,)), ((), ())),
                             preferred_element_type=jnp.float32)   # (S, S)
    qk = qk + mask_ref[0]

    # numerically-stable softmax along last axis (matches torch.softmax)
    qk = qk - jnp.max(qk, axis=-1, keepdims=True)
    p = jnp.exp(qk)
    inv = pl.reciprocal(jnp.sum(p, axis=-1, keepdims=True))        # exact reciprocal, EUP path
    attn = p * inv

    # lane-dense (Dv padded to >=128) unmasked store
    o_ref[0] = jnp.dot(attn, v_ref[0], preferred_element_type=jnp.float32)


@jax.jit
def model_forward(q, k, v1, mask, w1, b1, w2, b2):
    B, S, D = q.shape
    Dv = v1.shape[-1]

    # Fuse the two linears (no nonlinearity between them):
    #   linear2(linear1(x)) = x @ (W2 @ W1).T + (b1 @ W2.T + b2)
    # Pre-transpose the fused weight to (in, out) so the kernel does x @ wf directly.
    wf = (w2 @ w1).T                                   # (D_in, D_out)
    bf = (b1 @ w2.T + b2).reshape(1, D)                # (1, D)

    # Stack q and k along the seq axis -> one projection matmul per batch in the kernel.
    qk_in = jnp.concatenate([q, k], axis=1)            # (B, 2S, D)

    # Pad the value feature dim to a lane-dense multiple of 128 (unmasked output stores).
    Dv_pad = max(128, ((Dv + 127) // 128) * 128)
    v_pad = v1 if Dv_pad == Dv else jnp.pad(v1, ((0, 0), (0, 0), (0, Dv_pad - Dv)))

    out = pl.pallas_call(
        attn_kernel,
        out_shape=jax.ShapeDtypeStruct((B, S, Dv_pad), jnp.float32),
        grid_spec=pltpu.PrefetchScalarGridSpec(
            num_scalar_prefetch=0,
            grid=(B,),
            in_specs=[
                pl.BlockSpec((1, 2 * S, D), lambda b: (b, 0, 0)),     # [q;k]
                pl.BlockSpec((1, S, Dv_pad), lambda b: (b, 0, 0)),    # v (padded)
                pl.BlockSpec((1, S, S), lambda b: (0, 0, 0)),         # mask (broadcast over batch)
                pl.BlockSpec((D, D), lambda b: (0, 0)),               # fused W (in, out)
                pl.BlockSpec((1, D), lambda b: (0, 0)),               # fused b
            ],
            out_specs=pl.BlockSpec((1, S, Dv_pad), lambda b: (b, 0, 0)),
        ),
        compiler_params=pltpu.CompilerParams(dimension_semantics=("parallel",)),
    )(qk_in, v_pad, mask, wf, bf)

    return out[..., :Dv]


def reference_forward(q, k, v1, mask, w1, b1, w2, b2):
    # Unfused reference, matching the PyTorch module exactly.
    def two_linear(x):
        return (x @ w1.T + b1) @ w2.T + b2
    q2 = two_linear(q)
    k2 = two_linear(k)
    qk = q2 @ jnp.swapaxes(k2, -2, -1) / math.sqrt(q2.shape[-1])
    qk = qk + mask
    attn = jax.nn.softmax(qk, axis=-1)
    return attn @ v1


if __name__ == "__main__":
    B, S, D = 2, 8, 32   # batch, seq, hidden (in_features == out_features == D)
    key = jax.random.PRNGKey(0)
    kq, kk, kv, km, kw1, kb1, kw2, kb2 = jax.random.split(key, 8)

    q = jax.random.normal(kq, (B, S, D), dtype=jnp.float32)
    k = jax.random.normal(kk, (B, S, D), dtype=jnp.float32)
    v1 = jax.random.normal(kv, (B, S, D), dtype=jnp.float32)
    # additive attention mask: -1e9 at ~30% of positions, 0 elsewhere
    mask = jnp.where(jax.random.uniform(km, (1, S, S)) > 0.7,
                     jnp.float32(-1e9), jnp.float32(0.0))

    # deterministic nn.Linear-style parameters
    lim = 1.0 / math.sqrt(D)
    w1 = jax.random.uniform(kw1, (D, D), minval=-lim, maxval=lim, dtype=jnp.float32)
    b1 = jax.random.uniform(kb1, (1, D), minval=-lim, maxval=lim, dtype=jnp.float32)
    w2 = jax.random.uniform(kw2, (D, D), minval=-lim, maxval=lim, dtype=jnp.float32)
    b2 = jax.random.uniform(kb2, (1, D), minval=-lim, maxval=lim, dtype=jnp.float32)

    out = model_forward(q, k, v1, mask, w1, b1, w2, b2)
    out = jax.block_until_ready(out)

    ref = reference_forward(q, k, v1, mask, w1, b1, w2, b2)
    # Tolerance slightly relaxed vs. 1e-5: the fused affine map (W2@W1) is algebraically
    # exact but changes f32 rounding order relative to the unfused reference.
    np.testing.assert_allclose(np.asarray(out), np.asarray(ref), rtol=2e-5, atol=2e-5)

    print("KERNEL_OK")
</pallas_src>

<mosaic_0001>
module attributes {stable_mosaic.version = 11 : i64} {
  func.func @attn_kernel(%arg0: i32, %arg1: memref<1x16x32xf32, #tpu.memory_space<vmem>>, %arg2: memref<1x8x128xf32, #tpu.memory_space<vmem>>, %arg3: memref<1x8x8xf32, #tpu.memory_space<vmem>>, %arg4: memref<32x32xf32, #tpu.memory_space<vmem>>, %arg5: memref<1x32xf32, #tpu.memory_space<vmem>>, %arg6: memref<1x8x128xf32, #tpu.memory_space<vmem>>) attributes {dimension_semantics = [#tpu.dimension_semantics<parallel>], iteration_bounds = array<i64: 2>, scalar_prefetch = 0 : i64, scratch_operands = 0 : i64, tpu.core_type = #tpu.core_type<tc>, window_params = [{transform_indices = @transform_0, window_bounds = array<i64: 1, 16, 32>}, {transform_indices = @transform_1, window_bounds = array<i64: 1, 8, 128>}, {pipeline_mode = #tpu.pipeline_mode<synchronous>, transform_indices = @transform_2, window_bounds = array<i64: 1, 8, 8>}, {pipeline_mode = #tpu.pipeline_mode<synchronous>, transform_indices = @transform_3, window_bounds = array<i64: 32, 32>}, {pipeline_mode = #tpu.pipeline_mode<synchronous>, transform_indices = @transform_4, window_bounds = array<i64: 1, 32>}, {transform_indices = @transform_5, window_bounds = array<i64: 1, 8, 128>}]} {
    %c0 = arith.constant 0 : index
    %c0_0 = arith.constant 0 : index
    %c0_1 = arith.constant 0 : index
    %0 = vector.load %arg1[%c0, %c0_0, %c0_1] : memref<1x16x32xf32, #tpu.memory_space<vmem>>, vector<1x16x32xf32>
    %1 = vector.shape_cast %0 : vector<1x16x32xf32> to vector<16x32xf32>
    %c0_2 = arith.constant 0 : index
    %c0_3 = arith.constant 0 : index
    %2 = vector.load %arg4[%c0_2, %c0_3] : memref<32x32xf32, #tpu.memory_space<vmem>>, vector<32x32xf32>
    %cst = arith.constant dense<0.000000e+00> : vector<16x32xf32>
    %3 = tpu.matmul %1, %2, %cst {dimension_numbers = #tpu.dot_dimension_numbers<[1], [0], [0], [1], [0, 0, 1, 1], [], []>} : vector<16x32xf32>, vector<32x32xf32>, vector<16x32xf32> -> vector<16x32xf32>
    %c0_4 = arith.constant 0 : index
    %c0_5 = arith.constant 0 : index
    %4 = vector.load %arg5[%c0_4, %c0_5] : memref<1x32xf32, #tpu.memory_space<vmem>>, vector<1x32xf32>
    %5 = vector.broadcast %4 : vector<1x32xf32> to vector<16x32xf32>
    %6 = arith.addf %3, %5 : vector<16x32xf32>
    %7 = vector.extract_strided_slice %6 {offsets = [0, 0], sizes = [8, 32], strides = [1, 1]} : vector<16x32xf32> to vector<8x32xf32>
    %cst_6 = arith.constant 0.176776692 : f32
    %8 = vector.broadcast %cst_6 : f32 to vector<8x32xf32>
    %9 = arith.mulf %7, %8 : vector<8x32xf32>
    %10 = vector.extract_strided_slice %6 {offsets = [8, 0], sizes = [8, 32], strides = [1, 1]} : vector<16x32xf32> to vector<8x32xf32>
    %cst_7 = arith.constant dense<0.000000e+00> : vector<8x8xf32>
    %11 = tpu.matmul %9, %10, %cst_7 {dimension_numbers = #tpu.dot_dimension_numbers<[1], [1], [0], [0], [0, 0, 1, 0], [], []>} : vector<8x32xf32>, vector<8x32xf32>, vector<8x8xf32> -> vector<8x8xf32>
    %c0_8 = arith.constant 0 : index
    %c0_9 = arith.constant 0 : index
    %c0_10 = arith.constant 0 : index
    %12 = vector.load %arg3[%c0_8, %c0_9, %c0_10] : memref<1x8x8xf32, #tpu.memory_space<vmem>>, vector<1x8x8xf32>
    %13 = vector.shape_cast %12 : vector<1x8x8xf32> to vector<8x8xf32>
    %14 = arith.addf %11, %13 : vector<8x8xf32>
    %cst_11 = arith.constant dense<0xFF800000> : vector<8xf32>
    %15 = vector.multi_reduction <maximumf>, %14, %cst_11 [1] : vector<8x8xf32> to vector<8xf32>
    %16 = vector.shape_cast %15 : vector<8xf32> to vector<8x1xf32>
    %17 = vector.broadcast %16 : vector<8x1xf32> to vector<8x8xf32>
    %18 = arith.subf %14, %17 : vector<8x8xf32>
    %19 = math.exp %18 : vector<8x8xf32>
    %cst_12 = arith.constant dense<0.000000e+00> : vector<8xf32>
    %20 = vector.multi_reduction <add>, %19, %cst_12 [1] : vector<8x8xf32> to vector<8xf32>
    %21 = vector.shape_cast %20 : vector<8xf32> to vector<8x1xf32>
    %22 = tpu.reciprocal %21 : vector<8x1xf32> -> vector<8x1xf32>
    %23 = vector.broadcast %22 : vector<8x1xf32> to vector<8x8xf32>
    %24 = arith.mulf %19, %23 : vector<8x8xf32>
    %c0_13 = arith.constant 0 : index
    %c0_14 = arith.constant 0 : index
    %c0_15 = arith.constant 0 : index
    %25 = vector.load %arg2[%c0_13, %c0_14, %c0_15] : memref<1x8x128xf32, #tpu.memory_space<vmem>>, vector<1x8x128xf32>
    %26 = vector.shape_cast %25 : vector<1x8x128xf32> to vector<8x128xf32>
    %cst_16 = arith.constant dense<0.000000e+00> : vector<8x128xf32>
    %27 = tpu.matmul %24, %26, %cst_16 {dimension_numbers = #tpu.dot_dimension_numbers<[1], [0], [0], [1], [0, 0, 1, 1], [], []>} : vector<8x8xf32>, vector<8x128xf32>, vector<8x128xf32> -> vector<8x128xf32>
    %c0_17 = arith.constant 0 : index
    %c0_18 = arith.constant 0 : index
    %c0_19 = arith.constant 0 : index
    %28 = vector.load %arg6[%c0_17, %c0_18, %c0_19] : memref<1x8x128xf32, #tpu.memory_space<vmem>>, vector<1x8x128xf32>
    %29 = vector.shape_cast %28 : vector<1x8x128xf32> to vector<8x128xf32>
    %30 = vector.shape_cast %27 : vector<8x128xf32> to vector<1x8x128xf32>
    tpu.vector_store %arg6[%c0_17, %c0_18, %c0_19], %30 {strides = array<i32>} : memref<1x8x128xf32, #tpu.memory_space<vmem>>, vector<1x8x128xf32>,
    return
  }
  func.func @transform_0(%arg0: i32) -> (i32, i32, i32) {
    %c0_i32 = arith.constant 0 : i32
    %c0_i32_0 = arith.constant 0 : i32
    %c0_i32_1 = arith.constant 0 : i32
    return %arg0, %c0_i32, %c0_i32_0 : i32, i32, i32
  }
  func.func @transform_1(%arg0: i32) -> (i32, i32, i32) {
    %c0_i32 = arith.constant 0 : i32
    %c0_i32_0 = arith.constant 0 : i32
    %c0_i32_1 = arith.constant 0 : i32
    return %arg0, %c0_i32, %c0_i32_0 : i32, i32, i32
  }
  func.func @transform_2(%arg0: i32) -> (i32, i32, i32) {
    %c0_i32 = arith.constant 0 : i32
    %c0_i32_0 = arith.constant 0 : i32
    %c0_i32_1 = arith.constant 0 : i32
    %c0_i32_2 = arith.constant 0 : i32
    return %c0_i32, %c0_i32_0, %c0_i32_1 : i32, i32, i32
  }
  func.func @transform_3(%arg0: i32) -> (i32, i32) {
    %c0_i32 = arith.constant 0 : i32
    %c0_i32_0 = arith.constant 0 : i32
    %c0_i32_1 = arith.constant 0 : i32
    return %c0_i32, %c0_i32_0 : i32, i32
  }
  func.func @transform_4(%arg0: i32) -> (i32, i32) {
    %c0_i32 = arith.constant 0 : i32
    %c0_i32_0 = arith.constant 0 : i32
    %c0_i32_1 = arith.constant 0 : i32
    return %c0_i32, %c0_i32_0 : i32, i32
  }
  func.func @transform_5(%arg0: i32) -> (i32, i32, i32) {
    %c0_i32 = arith.constant 0 : i32
    %c0_i32_0 = arith.constant 0 : i32
    %c0_i32_1 = arith.constant 0 : i32
    return %arg0, %c0_i32, %c0_i32_0 : i32, i32, i32
  }
}

</mosaic_0001>

<bundles_post_ra>
// kernel: model_forward.1
= control target key start
LH: loop header
LB: loop body
LE: loop exit
PB: predicated region body
PF: predicated region fallthrough
CT: control target
= control target key end

     0   :  { %10 = vsyncpa [#allocation3], 0  ;;  %s718_s0 = inlined_call_operand.vmem [shape: f32[2,16,32], index: 0, kind: input, shape index: {}]   ;;  %s719_s1 = inlined_call_operand.vmem [shape: f32[2,8,128], index: 1, kind: input, shape index: {}]   ;;  %s720_s2 = inlined_call_operand.vmem [shape: f32[1,8,8], index: 2, kind: input, shape index: {}]   ;;  %s721_s3 = inlined_call_operand.vmem [shape: f32[32,32], index: 3, kind: input, shape index: {}]   ;;  %s722_s4 = inlined_call_operand.vmem [shape: f32[1,32], index: 4, kind: input, shape index: {}]   ;;  %s723_s5 = inlined_call_operand.hbm [shape: f32[2,8,128], index: 5, kind: output, shape index: {}]  }
   0x1   :  { %12 = vsyncpa [#allocation3 + $0x1], 0  ;;  %s605_s18 = smov 0   ;;  %s607_s19 = smov 0  }
   0x2   :  { %s609_s20 = smov 0   ;;  %s611_s21 = smov 0  }
   0x3 LB: > { %s626_s22 = sadd.s32 4294967295, %s573_s21   ;;  %s445_s23 = sadd.s32 4294967294, %s573_s21   ;;  %s573_s21 = sphi %s611_s21, %s729_s21   ;;  %s569_s20 = sphi %s609_s20, %s728_s20   ;;  %s565_s19 = sphi %s607_s19, %s727_s19   ;;  %s561_s18 = sphi %s605_s18, %s726_s18  }
   0x4   : > { %s630_s24 = sadd.s32 1, %s573_s21   ;;  %s140_s25 = sadd.s32 1, %s569_s20 }
   0x5   : > { %s137_s26 = ssub.s32 %s573_s21, %s630_s24  ;;  %p150_p0 = scmp.ne.s32.totalorder %s569_s20, %s565_s19 }
   0x6   : > { %p138_p1 = scmp.eq.s32.totalorder %s137_s26, 0  ;;  %p151_p2 = scmp.eq.s32.totalorder %s626_s22, 1 }
   0x7   : > { %p156_p3 = scmp.ne.s32.totalorder %s565_s19, %s561_s18  ;;  %p157_p4 = scmp.eq.s32.totalorder %s445_s23, 1 }
   0x8   : > { %s641_s27 = scalar_select %p138_p1, %s569_s20, %s140_s25  }
   0x9   : > { %p643_p5 = por %p151_p2, %p150_p0  ;;  %p647_p6 = por %p157_p4, %p156_p3 }
   0xa   : > { %p448_p7 = scmp.ge.s32.totalorder %s573_s21, 1  ;;  %p199_p8 = scmp.lt.s32.totalorder %s573_s21, 3 }
   0xc   : > { %p200_p9 = pnand %p448_p7, %p199_p8 }
   0xd   : > { %p231_p10 = scmp.lt.s32.totalorder (!%p200_p9), %s626_s22, 1  ;;  %s228_s10 = sand.u32 (!%p200_p9), 1, %s565_s19  }
   0xe   : > { %203 = sbr.rel (%p200_p9) target bundleno = 691 (0x2b3), region = 40  ;;  %s459_s12 = sshll.u32 (!%p200_p9), %s626_s22, 3 }
   0xf   : > { %s369_s15 = scalar_lea.hbm (!%p200_p9), %s723_s5, %s459_s12  ;;  %s359_s25 = scalar_lea.sflag (!%p200_p9), [#allocation3], %s228_s10 }
  0x10   : > { %s373_s23 = sshll.u32 (!%p200_p9), %s369_s15, 4  ;;  %s531_s7 = scalar_lea.hbm (!%p200_p9), %s723_s5, 16  ;;  %s374_s23 = int_to_ptr.hbm [resolvable:$true] %s373_s23 }
  0x11   : > { %s525_s26 = sshra.s32 (!%p200_p9), %s374_s23, 4  ;;  %s526_s26 = int_to_ptr.hbm [resolvable:$true] %s525_s26 }
  0x12   : > { %s527_s30 = scalar_lea.hbm (!%p200_p9), %s526_s26, 8  ;;  %p532_p0 = scmp.lt.s32.totalorder (!%p200_p9), %s526_s26, %s723_s5 }
  0x13   : > { %v245_v0 = vld [vmem:[%s721_s3 + $0x18] sm:$0xff]  ;;  %v244_v1 = vld [vmem:[%s721_s3 + $0x10] sm:$0xff]  ;;  %v243_v2 = vld [vmem:[%s721_s3 + $0x8] sm:$0xff]  ;;  %s664_s11 = scalar_select %p231_p10, %s626_s22, 1  ;;  %vm250_vm0 = vcmask 261120   ;;  %vm308_vm1 = vcmask 64512  }
  0x14   : > { %463 = vmatpush.msra.mxu3 %v245_v0  ;;  %269 = vmatpush.msra.mxu0 %v245_v0  ;;  %v242_v3 = vld [vmem:[%s721_s3] sm:$0xff]  ;;  %p528_p11 = scmp.ne.s32.totalorder %s526_s26, %s527_s30  ;;  %p533_p1 = scmp.lt.s32.totalorder %s531_s7, %s527_s30 }
  0x15   : > { %s462_s14 = sshll.u32 %s664_s11, 4  ;;  %v506_v6 = vld [vmem:[%s722_s4] ss:$0 sm:$0xff]  ;;  %s452_s6 = sshll.u32 %s664_s11, 3 }
  0x16   : > { %464 = vmatpush.msra.mxu3 %v244_v1  ;;  %270 = vmatpush.msra.mxu0 %v244_v1  ;;  %s235_s17 = scalar_lea.vmem %s718_s0, %s462_s14  ;;  %v281_v12 = vld [vmem:[%s720_s2] sm:$0xff]  ;;  %s239_s9 = scalar_lea.vmem %s719_s1, %s452_s6 }
  0x17   : > { %v241_v4 = vld [vmem:[%s235_s17 + $0x8] sm:$0xff]  ;;  %v240_v5 = vld [vmem:[%s235_s17] sm:$0xff]  ;;  %s449_s11 = sshll.u32 %s228_s10, 3  ;;  %p529_p12 = pnand %p528_p11, %p643_p5 }
  0x18   : > { %465 = vmatpush.msra.mxu3 %v243_v2  ;;  %271 = vmatpush.msra.mxu0 %v243_v2  ;;  %v333_v21 = vld [vmem:[%s239_s9] sm:$0xff]  ;;  %s230_s16 = scalar_lea.vmem [#allocation2], %s449_s11  ;;  %p534_p2 = por %p533_p1, %p532_p0 }
  0x19   : > { %352 = vmatpush.msra.mxu2 %v333_v21  ;;  %s371_s17 = sshll.u32 %s230_s16, 4  ;;  %p530_p13 = pneg %p529_p12  ;;  %s372_s17 = int_to_ptr.vmem [resolvable:$true] %s371_s17 }
  0x1a   : > { %466 = vmatpush.msra.mxu3 %v242_v3  ;;  %272 = vmatpush.msra.mxu0 %v242_v3 }
  0x1b   : > { %454 = vmatmul.msk.f32.vlgmr.msra.gmra.mxu3 %vm250_vm0, %v241_v4  ;;  %453 = vmatmul.msk.f32.vlgmr.msra.gmra.mxu0 %vm250_vm0, %v240_v5  ;;  %p535_p3 = pnand %p534_p2, %p530_p13 }
  0x98   : > { %v274_v7 = vpop.f32.mrf.mxu0 }
  0x99   : > { %v275_v8 = vadd.f32 %v506_v6, %v274_v7 }
  0x9b   : > { %v280_v11 = vmul.f32 0.17677669, %v275_v8 }
  0x9e   : > { %v277_v9 = vpop.f32.mrf.mxu3 }
  0x9f   : > { %v278_v10 = vadd.f32 %v506_v6, %v277_v9 }
  0xa1   : > { %455 = vmatpush.xpose.msk.msra.mxu1 %vm250_vm0, %v278_v10 }
  0xa4   : > { %456 = vmatmul.msk.f32.vlgmr.msra.gmra.mxu1 %vm250_vm0, %v280_v11 }
 0x121   : > { %v305_v13 = vpop.f32.mrf.mxu1 }
 0x122   : > { %v306_v14 = vadd.f32 %v305_v13, %v281_v12 }
 0x124   : > { %v309_v15 = vsel %vm308_vm1, %v306_v14, -inf }
 0x125   : > { %310 = vmax.xlane.f32.xlu0 %v309_v15 }
 0x198   : > { %v311_v16 = vpop.xlane.xlu0 %310 }
 0x199   : > { %v312_v17 = vsub.f32 %v306_v14, %v311_v16 }
 0x19b   : > { %v313_v18 = vmul.f32 1.442695, %v312_v17 }
 0x19d   : > { %507 = vpow2.f32 %v313_v18 }
 0x1a3   : > { %v508_v19 = vpop.eup %507 }
 0x1a4   : > { %v315_v20 = vsel %vm308_vm1, %v508_v19, 0.0 }
 0x1a5   : > { %316 = vadd.xlane.f32.xlu0 %v315_v20 }
 0x218   : > { %v317_v22 = vpop.xlane.xlu0 %316 }
 0x219   : > { %509 = vrcp.f32 %v317_v22  ;;  %v329_v26 = vand.u32 2147483648, %v317_v22  ;;  %v327_v28 = vand.u32 2147483647, %v317_v22  ;;  %vm323_vm3 = vweird.f32 %v317_v22 }
 0x21b   : > { %v330_v30 = vor.u32 1.1754944e-38, %v329_v26  ;;  %vm328_vm5 = vcmp.eq.f32.partialorder %v327_v28, 8.507059e+37 }
 0x21f   : > { %v510_v23 = vpop.eup %509 }
 0x220   : > { %v319_v24 = vmul.f32 %v510_v23, %v317_v22  ;;  %vm324_vm2 = vweird.f32 %v510_v23 }
 0x221   : > { %vm325_vm4 = vmor %vm323_vm3, %vm324_vm2 }
 0x222   : > { %v320_v25 = vsub.f32 1.0, %v319_v24 }
 0x224   : > { %v321_v27 = vmul.f32 %v510_v23, %v320_v25 }
 0x226   : > { %v322_v29 = vadd.f32 %v510_v23, %v321_v27 }
 0x228   : > { %v326_v31 = vsel %vm325_vm4, %v510_v23, %v322_v29 }
 0x229   : > { %v331_v32 = vsel %vm328_vm5, %v330_v30, %v326_v31 }
 0x22a   : > { %v332_v33 = vmul.f32 %v508_v19, %v331_v32 }
 0x22c   : > { %457 = vmatmul.msk.f32.vlgmr.msra.gmra.mxu2 %vm308_vm1, %v332_v33 }
 0x2af   : > { %v354_v34 = vpop.f32.mrf.mxu2 }
 0x2b0   : > { %357 = vst [vmem:[%s230_s16] sm:$0xff] %v354_v34 }
 0x2b1   : > { %538 = shalt.err (!%p535_p3)
}
 0x2b2   : > { %467 = dma.vmem_to_hbm [thread:$0]  (%p643_p5), %s372_s17, 128, %s374_s23, %s359_s25  }
 0x2b3 PF: > { %p473_p4 = scmp.ge.s32.totalorder %s573_s21, 2  ;;  %s385_s10 = sand.u32 1, %s561_s18  }
 0x2b4   : > { %s386_s11 = scalar_lea.sflag [#allocation3], %s385_s10 }
 0x2b5   : > { %p470_p7 = pnand %p473_p4, %p647_p6 }
 0x2b7   : > { %p471_p8 = pneg %p470_p7 }
 0x2b9   : > { %556 = dma.done.wait (%p471_p8), %s386_s11, 128  }
 0x2ba   : > { %558 = vsyncadd (%p471_p8), %s386_s11, 4294967168  ;;  %p15_p9 = scmp.ge.s32.totalorder %s630_s24, 4   ;;  %s726_s18 = smov %s565_s19 }
 0x2bb   : > { %s727_s19 = smov %s569_s20  ;;  %s728_s20 = smov %s641_s27 }
 0x2bc   : > { %s729_s21 = smov %s630_s24  ;;  %17 = sbr.rel (!%p15_p9) target bundleno = 3 (0x3), region = 78 }
 0x2c1   :  { %392 = vsyncpa [#allocation3], 1 }
 0x2c2   :  { %394 = vsyncpa [#allocation3 + $0x1], 1 }

</bundles_post_ra>
